<compile_context>
chip_gen: v5e
topology: v5e:2x2
jax: 0.10.0
libtpu: 0.0.40
codegen_flags: <defaults>
</compile_context>

<pallas_src>
import functools

import jax
import jax.numpy as jnp
from jax.experimental import pallas as pl
from jax.experimental.pallas import tpu as pltpu

_MIB = 1024 * 1024


def _dist_partials_kernel(s_ref, t_ref, out_ref, inter_acc, col_acc, *,
                          tem, eps, num_classes):
    t_id = pl.program_id(1)

    # ---- init running accumulators on this core's first batch tile ----------
    @pl.when(t_id == 0)
    def _init():
        inter_acc[0] = jnp.float32(0.0)
        col_acc[...] = jnp.zeros_like(col_acc)

    tile = s_ref.shape[0]
    inv_tem = jnp.float32(1.0 / tem)
    s = s_ref[...].astype(jnp.float32) * inv_tem
    t = t_ref[...].astype(jnp.float32) * inv_tem

    # Numerically-stable softmax along the class (lane) axis.  The
    # normalization reciprocal runs on the otherwise-idle EUP slot; its error
    # only enters the Pearson ratios at second order.
    e_s = jnp.exp(s - jnp.max(s, axis=1, keepdims=True))
    y_s = e_s * pl.reciprocal(jnp.sum(e_s, axis=1, keepdims=True), approx=True)
    e_t = jnp.exp(t - jnp.max(t, axis=1, keepdims=True))
    y_t = e_t * pl.reciprocal(jnp.sum(e_t, axis=1, keepdims=True), approx=True)
    # TODO(synk): on v6e/v7x the exp could run in bf16 (EUP bf16) if profiling
    # shows the EUP slot saturating; v5e's EUP lacks bf16, so keep f32 here.

    # Shifted values: softmax rows sum to 1, so 1/C is the exact row mean and
    # u_* are already row-centered.  Zero-padded logit rows give a uniform
    # softmax -> u ~= 0, so they drop out of every accumulator below.
    inv_c = jnp.float32(1.0 / num_classes)
    u_s = y_s - inv_c
    u_t = y_t - inv_c

    # Hoisted products, reused by both the row and the column moments.
    p_ss = u_s * u_s
    p_tt = u_t * u_t
    p_st = u_s * u_t

    # ---- inter-class relation: per-row Pearson over classes -----------------
    row_ss = jnp.sum(p_ss, axis=1, keepdims=True)   # XLU lane reductions
    row_tt = jnp.sum(p_tt, axis=1, keepdims=True)
    row_st = jnp.sum(p_st, axis=1, keepdims=True)
    # eps placement matches the reference: added to the product of the norms.
    p_rows = row_st / (jnp.sqrt(row_ss) * jnp.sqrt(row_tt) + eps)
    inter_acc[0] = inter_acc[0] + jnp.sum(p_rows)

    # ---- intra-class relation: per-class (column) moments on the MXU --------
    ones_rows = jnp.ones((8, tile), jnp.float32)

    def col_sum(m):
        # Every row of (ones @ m) equals the column sum; keep row 0.
        return jnp.dot(ones_rows, m, preferred_element_type=jnp.float32)[0:1, :]

    col_acc[0:1, :] = col_acc[0:1, :] + col_sum(u_s)
    col_acc[1:2, :] = col_acc[1:2, :] + col_sum(u_t)
    col_acc[2:3, :] = col_acc[2:3, :] + col_sum(p_ss)
    col_acc[3:4, :] = col_acc[3:4, :] + col_sum(p_tt)
    col_acc[4:5, :] = col_acc[4:5, :] + col_sum(p_st)

    # ---- emit this core's partials on its last batch tile -------------------
    @pl.when(t_id == pl.num_programs(1) - 1)
    def _emit():
        out_ref[0:1, 0:5, :] = col_acc[...].reshape(1, 5, num_classes)
        out_ref[0:1, 5:6, :] = jnp.full((1, 1, num_classes), inter_acc[0],
                                        jnp.float32)


def _vmem_limit_bytes():
    # Raise the scoped-VMEM limit toward the physical capacity of the chip:
    # ~96 MiB on 128-MiB parts (v5e/v6e), ~48 MiB on v7x's 64-MiB parts.
    try:
        cap = int(pltpu.get_tpu_info().vmem_capacity_bytes)
    except Exception:
        cap = 64 * _MIB   # conservative fallback (matches the smallest part)
    return min(96 * _MIB, (cap * 3) // 4)


def _pick_tile(num_classes, in_itemsize, vmem_limit):
    # Per batch-row VMEM footprint of one grid step:
    #   * 2 inputs x 2 pipeline buffers of the *input* dtype,
    #   * ~6 live full-tile f32 temporaries (scaled logits, exp, u_*, products),
    #   * ~4 live lane-padded (tile, 1) f32 row temporaries (512 B/row each),
    #   * the (8, tile) f32 ones operand of the MXU column reductions.
    bytes_per_row = (num_classes * (2 * 2 * in_itemsize + 6 * 4)
                     + 4 * 512 + 8 * 4)
    budget = int(vmem_limit * 0.6)
    tile = budget // max(bytes_per_row, 1)
    return max(8, (tile // 8) * 8)


def dist_loss(logits_student, logits_teacher, *, beta=2.0, gamma=2.0, tem=4.0,
              eps=1e-5, tile=None):
    assert logits_student.shape == logits_teacher.shape
    B, C = logits_student.shape

    vmem_limit = _vmem_limit_bytes()
    itemsize = logits_student.dtype.itemsize   # bf16 halves HBM traffic

    # Split the batch over a leading "parallel" grid axis so both TensorCores
    # are used on v7x (sequential and essentially free on 1-TC chips).
    cores = 2 if B >= 16 else 1
    rows_per_core = pl.cdiv(B, cores * 8) * 8

    if tile is None:
        tile = _pick_tile(C, itemsize, vmem_limit)
    tile = max(8, (int(tile) // 8) * 8)
    tile = min(tile, rows_per_core)

    tiles_per_core = pl.cdiv(rows_per_core, tile)
    rows_per_core = tiles_per_core * tile
    b_pad = cores * rows_per_core

    if b_pad != B:
        pad = b_pad - B
        # Zero-padded rows become uniform softmax rows; with the shifted
        # (u = y - 1/C) accumulation they contribute ~0, so no masking needed.
        logits_student = jnp.pad(logits_student, ((0, pad), (0, 0)))
        logits_teacher = jnp.pad(logits_teacher, ((0, pad), (0, 0)))

    kernel = functools.partial(_dist_partials_kernel, tem=float(tem),
                               eps=float(eps), num_classes=C)

    in_map = lambda c, t: (c * tiles_per_core + t, 0)
    partials = pl.pallas_call(
        kernel,
        out_shape=jax.ShapeDtypeStruct((cores, 6, C), jnp.float32),
        grid=(cores, tiles_per_core),
        in_specs=[
            pl.BlockSpec((tile, C), in_map),
            pl.BlockSpec((tile, C), in_map),
        ],
        out_specs=pl.BlockSpec((1, 6, C), lambda c, t: (c, 0, 0)),
        scratch_shapes=[
            pltpu.SMEM((1,), jnp.float32),    # running inter-loss (row Pearson) sum
            pltpu.VMEM((5, C), jnp.float32),  # sum u_s, u_t, u_s^2, u_t^2, u_s*u_t
        ],
        compiler_params=pltpu.CompilerParams(
            dimension_semantics=("parallel", "arbitrary"),
            vmem_limit_bytes=vmem_limit),
    )(logits_student, logits_teacher)

    # ---- tiny O(C) finalize in plain JAX (combines the per-core partials) ----
    n = jnp.float32(B)
    col = jnp.sum(partials[:, 0:5, :], axis=0)
    cs, ct, css, ctt, cst = col[0], col[1], col[2], col[3], col[4]
    num = cst - cs * ct / n
    var_s = jnp.maximum(css - cs * cs / n, 0.0)
    var_t = jnp.maximum(ctt - ct * ct / n, 0.0)
    p_cols = num / (jnp.sqrt(var_s) * jnp.sqrt(var_t) + eps)
    intra_mean = jnp.mean(p_cols)
    inter_mean = jnp.sum(partials[:, 5, 0]) / n

    tem2 = jnp.float32(tem * tem)
    inter_loss = tem2 * (1.0 - inter_mean)
    intra_loss = tem2 * (1.0 - intra_mean)
    return beta * inter_loss + gamma * intra_loss


def _dist_loss_ref(logits_student, logits_teacher, beta=2.0, gamma=2.0,
                   tem=4.0, eps=1e-5):
    # Pure-JAX reference mirroring the PyTorch module, for verification.
    y_s = jax.nn.softmax(logits_student.astype(jnp.float32) / tem, axis=1)
    y_t = jax.nn.softmax(logits_teacher.astype(jnp.float32) / tem, axis=1)

    def pearson_mean(a, b, axis):
        a_c = a - jnp.mean(a, axis=axis, keepdims=True)
        b_c = b - jnp.mean(b, axis=axis, keepdims=True)
        num = jnp.sum(a_c * b_c, axis=axis)
        den = (jnp.linalg.norm(a_c, axis=axis) *
               jnp.linalg.norm(b_c, axis=axis) + eps)
        return jnp.mean(num / den)

    inter = tem ** 2 * (1.0 - pearson_mean(y_s, y_t, 1))
    intra = tem ** 2 * (1.0 - pearson_mean(y_s, y_t, 0))
    return beta * inter + gamma * intra


if __name__ == "__main__":
    key = jax.random.PRNGKey(0)
    k1, k2, k3, k4, k5, k6 = jax.random.split(key, 6)

    # CIFAR-10 style logits: small batch, 10 classes (single tile, single core).
    B, C = 8, 10
    logits_student = jax.random.normal(k1, (B, C), dtype=jnp.float32)
    logits_teacher = jax.random.normal(k2, (B, C), dtype=jnp.float32)
    loss = dist_loss(logits_student, logits_teacher)
    jax.block_until_ready(loss)
    ref = _dist_loss_ref(logits_student, logits_teacher)
    assert jnp.allclose(loss, ref, atol=2e-3, rtol=2e-3), (loss, ref)

    # Multi-tile streaming path with a 2-way core split and padded final tiles.
    B2, C2 = 20, 16
    ls2 = jax.random.normal(k3, (B2, C2), dtype=jnp.float32)
    lt2 = jax.random.normal(k4, (B2, C2), dtype=jnp.float32)
    loss2 = dist_loss(ls2, lt2, tile=8)
    jax.block_until_ready(loss2)
    ref2 = _dist_loss_ref(ls2, lt2)
    assert jnp.allclose(loss2, ref2, atol=2e-3, rtol=2e-3), (loss2, ref2)

    # bf16 logits end-to-end (halved HBM traffic; kernel upcasts to f32 inside).
    B3, C3 = 64, 100
    ls3 = jax.random.normal(k5, (B3, C3), dtype=jnp.float32).astype(jnp.bfloat16)
    lt3 = jax.random.normal(k6, (B3, C3), dtype=jnp.float32).astype(jnp.bfloat16)
    loss3 = dist_loss(ls3, lt3)
    jax.block_until_ready(loss3)
    ref3 = _dist_loss_ref(ls3, lt3)
    assert jnp.allclose(loss3, ref3, atol=2e-3, rtol=2e-3), (loss3, ref3)

    print("KERNEL_OK")
</pallas_src>

<mosaic_0001>
module attributes {stable_mosaic.version = 11 : i64} {
  func.func @_dist_partials_kernel(%arg0: i32, %arg1: i32, %arg2: memref<8x10xf32, #tpu.memory_space<vmem>>, %arg3: memref<8x10xf32, #tpu.memory_space<vmem>>, %arg4: memref<1x6x10xf32, #tpu.memory_space<vmem>>, %arg5: memref<1xf32, #tpu.memory_space<smem>>, %arg6: memref<5x10xf32, #tpu.memory_space<vmem>>) attributes {dimension_semantics = [#tpu.dimension_semantics<parallel>, #tpu.dimension_semantics<arbitrary>], iteration_bounds = array<i64: 1, 1>, scalar_prefetch = 0 : i64, scratch_operands = 2 : i64, tpu.core_type = #tpu.core_type<tc>, window_params = [{transform_indices = @transform_0, window_bounds = array<i64: 8, 10>}, {transform_indices = @transform_1, window_bounds = array<i64: 8, 10>}, {transform_indices = @transform_2, window_bounds = array<i64: 1, 6, 10>}]} {
    %c0_i32 = arith.constant 0 : i32
    %0 = arith.cmpi eq, %arg1, %c0_i32 : i32
    %1 = arith.extui %0 : i1 to i32
    %c0_i32_0 = arith.constant 0 : i32
    %2 = arith.cmpi ne, %1, %c0_i32_0 : i32
    scf.if %2 {
      %cst_42 = arith.constant 0.000000e+00 : f32
      %c0_43 = arith.constant 0 : index
      %84 = memref.load %arg5[%c0_43] : memref<1xf32, #tpu.memory_space<smem>>
      memref.store %cst_42, %arg5[%c0_43] : memref<1xf32, #tpu.memory_space<smem>>
      %cst_44 = arith.constant 0.000000e+00 : f32
      %85 = vector.broadcast %cst_44 : f32 to vector<5x10xf32>
      %c0_45 = arith.constant 0 : index
      %c0_46 = arith.constant 0 : index
      %86 = vector.load %arg6[%c0_45, %c0_46] : memref<5x10xf32, #tpu.memory_space<vmem>>, vector<5x10xf32>
      tpu.vector_store %arg6[%c0_45, %c0_46], %85 {strides = array<i32>} : memref<5x10xf32, #tpu.memory_space<vmem>>, vector<5x10xf32>,
    } else {
    }
    %c0 = arith.constant 0 : index
    %c0_1 = arith.constant 0 : index
    %3 = vector.load %arg2[%c0, %c0_1] : memref<8x10xf32, #tpu.memory_space<vmem>>, vector<8x10xf32>
    %cst = arith.constant 2.500000e-01 : f32
    %4 = vector.broadcast %cst : f32 to vector<8x10xf32>
    %5 = arith.mulf %3, %4 : vector<8x10xf32>
    %c0_2 = arith.constant 0 : index
    %c0_3 = arith.constant 0 : index
    %6 = vector.load %arg3[%c0_2, %c0_3] : memref<8x10xf32, #tpu.memory_space<vmem>>, vector<8x10xf32>
    %cst_4 = arith.constant 2.500000e-01 : f32
    %7 = vector.broadcast %cst_4 : f32 to vector<8x10xf32>
    %8 = arith.mulf %6, %7 : vector<8x10xf32>
    %cst_5 = arith.constant dense<0xFF800000> : vector<8xf32>
    %9 = vector.multi_reduction <maximumf>, %5, %cst_5 [1] : vector<8x10xf32> to vector<8xf32>
    %10 = vector.shape_cast %9 : vector<8xf32> to vector<8x1xf32>
    %11 = vector.broadcast %10 : vector<8x1xf32> to vector<8x10xf32>
    %12 = arith.subf %5, %11 : vector<8x10xf32>
    %13 = math.exp %12 : vector<8x10xf32>
    %cst_6 = arith.constant dense<0.000000e+00> : vector<8xf32>
    %14 = vector.multi_reduction <add>, %13, %cst_6 [1] : vector<8x10xf32> to vector<8xf32>
    %15 = vector.shape_cast %14 : vector<8xf32> to vector<8x1xf32>
    %16 = tpu.reciprocal %15 {approx = true} : vector<8x1xf32> -> vector<8x1xf32>
    %17 = vector.broadcast %16 : vector<8x1xf32> to vector<8x10xf32>
    %18 = arith.mulf %13, %17 : vector<8x10xf32>
    %cst_7 = arith.constant dense<0xFF800000> : vector<8xf32>
    %19 = vector.multi_reduction <maximumf>, %8, %cst_7 [1] : vector<8x10xf32> to vector<8xf32>
    %20 = vector.shape_cast %19 : vector<8xf32> to vector<8x1xf32>
    %21 = vector.broadcast %20 : vector<8x1xf32> to vector<8x10xf32>
    %22 = arith.subf %8, %21 : vector<8x10xf32>
    %23 = math.exp %22 : vector<8x10xf32>
    %cst_8 = arith.constant dense<0.000000e+00> : vector<8xf32>
    %24 = vector.multi_reduction <add>, %23, %cst_8 [1] : vector<8x10xf32> to vector<8xf32>
    %25 = vector.shape_cast %24 : vector<8xf32> to vector<8x1xf32>
    %26 = tpu.reciprocal %25 {approx = true} : vector<8x1xf32> -> vector<8x1xf32>
    %27 = vector.broadcast %26 : vector<8x1xf32> to vector<8x10xf32>
    %28 = arith.mulf %23, %27 : vector<8x10xf32>
    %cst_9 = arith.constant 1.000000e-01 : f32
    %29 = vector.broadcast %cst_9 : f32 to vector<8x10xf32>
    %30 = arith.subf %18, %29 : vector<8x10xf32>
    %cst_10 = arith.constant 1.000000e-01 : f32
    %31 = vector.broadcast %cst_10 : f32 to vector<8x10xf32>
    %32 = arith.subf %28, %31 : vector<8x10xf32>
    %33 = arith.mulf %30, %30 : vector<8x10xf32>
    %34 = arith.mulf %32, %32 : vector<8x10xf32>
    %35 = arith.mulf %30, %32 : vector<8x10xf32>
    %cst_11 = arith.constant dense<0.000000e+00> : vector<8xf32>
    %36 = vector.multi_reduction <add>, %33, %cst_11 [1] : vector<8x10xf32> to vector<8xf32>
    %37 = vector.shape_cast %36 : vector<8xf32> to vector<8x1xf32>
    %cst_12 = arith.constant dense<0.000000e+00> : vector<8xf32>
    %38 = vector.multi_reduction <add>, %34, %cst_12 [1] : vector<8x10xf32> to vector<8xf32>
    %39 = vector.shape_cast %38 : vector<8xf32> to vector<8x1xf32>
    %cst_13 = arith.constant dense<0.000000e+00> : vector<8xf32>
    %40 = vector.multi_reduction <add>, %35, %cst_13 [1] : vector<8x10xf32> to vector<8xf32>
    %41 = vector.shape_cast %40 : vector<8xf32> to vector<8x1xf32>
    %42 = math.sqrt %37 : vector<8x1xf32>
    %43 = math.sqrt %39 : vector<8x1xf32>
    %44 = arith.mulf %42, %43 : vector<8x1xf32>
    %cst_14 = arith.constant 9.99999974E-6 : f32
    %45 = vector.broadcast %cst_14 : f32 to vector<8x1xf32>
    %46 = arith.addf %44, %45 : vector<8x1xf32>
    %47 = arith.divf %41, %46 : vector<8x1xf32>
    %c0_15 = arith.constant 0 : index
    %48 = memref.load %arg5[%c0_15] : memref<1xf32, #tpu.memory_space<smem>>
    %49 = vector.shape_cast %47 : vector<8x1xf32> to vector<1x8x1xf32>
    %cst_16 = arith.constant dense<0.000000e+00> : vector<1xf32>
    %50 = vector.multi_reduction <add>, %49, %cst_16 [1, 2] : vector<1x8x1xf32> to vector<1xf32>
    %51 = vector.shape_cast %50 : vector<1xf32> to vector<1x1x1xf32>
    %52 = vector.extract %51[0, 0, 0] : f32 from vector<1x1x1xf32>
    %53 = arith.addf %48, %52 : f32
    %c0_17 = arith.constant 0 : index
    %54 = memref.load %arg5[%c0_17] : memref<1xf32, #tpu.memory_space<smem>>
    memref.store %53, %arg5[%c0_17] : memref<1xf32, #tpu.memory_space<smem>>
    %cst_18 = arith.constant 1.000000e+00 : f32
    %55 = vector.broadcast %cst_18 : f32 to vector<8x8xf32>
    %c0_19 = arith.constant 0 : index
    %c0_20 = arith.constant 0 : index
    %56 = vector.load %arg6[%c0_19, %c0_20] : memref<5x10xf32, #tpu.memory_space<vmem>>, vector<1x10xf32>
    %cst_21 = arith.constant dense<0.000000e+00> : vector<8x10xf32>
    %57 = tpu.matmul %55, %30, %cst_21 {dimension_numbers = #tpu.dot_dimension_numbers<[1], [0], [0], [1], [0, 0, 1, 1], [], []>} : vector<8x8xf32>, vector<8x10xf32>, vector<8x10xf32> -> vector<8x10xf32>
    %58 = vector.extract_strided_slice %57 {offsets = [0, 0], sizes = [1, 10], strides = [1, 1]} : vector<8x10xf32> to vector<1x10xf32>
    %59 = arith.addf %56, %58 : vector<1x10xf32>
    %c0_22 = arith.constant 0 : index
    %c0_23 = arith.constant 0 : index
    %60 = vector.load %arg6[%c0_22, %c0_23] : memref<5x10xf32, #tpu.memory_space<vmem>>, vector<1x10xf32>
    tpu.vector_store %arg6[%c0_22, %c0_23], %59 {strides = array<i32>} : memref<5x10xf32, #tpu.memory_space<vmem>>, vector<1x10xf32>,
    %c1 = arith.constant 1 : index
    %c0_24 = arith.constant 0 : index
    %61 = vector.load %arg6[%c1, %c0_24] : memref<5x10xf32, #tpu.memory_space<vmem>>, vector<1x10xf32>
    %cst_25 = arith.constant dense<0.000000e+00> : vector<8x10xf32>
    %62 = tpu.matmul %55, %32, %cst_25 {dimension_numbers = #tpu.dot_dimension_numbers<[1], [0], [0], [1], [0, 0, 1, 1], [], []>} : vector<8x8xf32>, vector<8x10xf32>, vector<8x10xf32> -> vector<8x10xf32>
    %63 = vector.extract_strided_slice %62 {offsets = [0, 0], sizes = [1, 10], strides = [1, 1]} : vector<8x10xf32> to vector<1x10xf32>
    %64 = arith.addf %61, %63 : vector<1x10xf32>
    %c1_26 = arith.constant 1 : index
    %c0_27 = arith.constant 0 : index
    %65 = vector.load %arg6[%c1_26, %c0_27] : memref<5x10xf32, #tpu.memory_space<vmem>>, vector<1x10xf32>
    tpu.vector_store %arg6[%c1_26, %c0_27], %64 {strides = array<i32>} : memref<5x10xf32, #tpu.memory_space<vmem>>, vector<1x10xf32>,
    %c2 = arith.constant 2 : index
    %c0_28 = arith.constant 0 : index
    %66 = vector.load %arg6[%c2, %c0_28] : memref<5x10xf32, #tpu.memory_space<vmem>>, vector<1x10xf32>
    %cst_29 = arith.constant dense<0.000000e+00> : vector<8x10xf32>
    %67 = tpu.matmul %55, %33, %cst_29 {dimension_numbers = #tpu.dot_dimension_numbers<[1], [0], [0], [1], [0, 0, 1, 1], [], []>} : vector<8x8xf32>, vector<8x10xf32>, vector<8x10xf32> -> vector<8x10xf32>
    %68 = vector.extract_strided_slice %67 {offsets = [0, 0], sizes = [1, 10], strides = [1, 1]} : vector<8x10xf32> to vector<1x10xf32>
    %69 = arith.addf %66, %68 : vector<1x10xf32>
    %c2_30 = arith.constant 2 : index
    %c0_31 = arith.constant 0 : index
    %70 = vector.load %arg6[%c2_30, %c0_31] : memref<5x10xf32, #tpu.memory_space<vmem>>, vector<1x10xf32>
    tpu.vector_store %arg6[%c2_30, %c0_31], %69 {strides = array<i32>} : memref<5x10xf32, #tpu.memory_space<vmem>>, vector<1x10xf32>,
    %c3 = arith.constant 3 : index
    %c0_32 = arith.constant 0 : index
    %71 = vector.load %arg6[%c3, %c0_32] : memref<5x10xf32, #tpu.memory_space<vmem>>, vector<1x10xf32>
    %cst_33 = arith.constant dense<0.000000e+00> : vector<8x10xf32>
    %72 = tpu.matmul %55, %34, %cst_33 {dimension_numbers = #tpu.dot_dimension_numbers<[1], [0], [0], [1], [0, 0, 1, 1], [], []>} : vector<8x8xf32>, vector<8x10xf32>, vector<8x10xf32> -> vector<8x10xf32>
    %73 = vector.extract_strided_slice %72 {offsets = [0, 0], sizes = [1, 10], strides = [1, 1]} : vector<8x10xf32> to vector<1x10xf32>
    %74 = arith.addf %71, %73 : vector<1x10xf32>
    %c3_34 = arith.constant 3 : index
    %c0_35 = arith.constant 0 : index
    %75 = vector.load %arg6[%c3_34, %c0_35] : memref<5x10xf32, #tpu.memory_space<vmem>>, vector<1x10xf32>
    tpu.vector_store %arg6[%c3_34, %c0_35], %74 {strides = array<i32>} : memref<5x10xf32, #tpu.memory_space<vmem>>, vector<1x10xf32>,
    %c4 = arith.constant 4 : index
    %c0_36 = arith.constant 0 : index
    %76 = vector.load %arg6[%c4, %c0_36] : memref<5x10xf32, #tpu.memory_space<vmem>>, vector<1x10xf32>
    %cst_37 = arith.constant dense<0.000000e+00> : vector<8x10xf32>
    %77 = tpu.matmul %55, %35, %cst_37 {dimension_numbers = #tpu.dot_dimension_numbers<[1], [0], [0], [1], [0, 0, 1, 1], [], []>} : vector<8x8xf32>, vector<8x10xf32>, vector<8x10xf32> -> vector<8x10xf32>
    %78 = vector.extract_strided_slice %77 {offsets = [0, 0], sizes = [1, 10], strides = [1, 1]} : vector<8x10xf32> to vector<1x10xf32>
    %79 = arith.addf %76, %78 : vector<1x10xf32>
    %c4_38 = arith.constant 4 : index
    %c0_39 = arith.constant 0 : index
    %80 = vector.load %arg6[%c4_38, %c0_39] : memref<5x10xf32, #tpu.memory_space<vmem>>, vector<1x10xf32>
    tpu.vector_store %arg6[%c4_38, %c0_39], %79 {strides = array<i32>} : memref<5x10xf32, #tpu.memory_space<vmem>>, vector<1x10xf32>,
    %c0_i32_40 = arith.constant 0 : i32
    %81 = arith.cmpi eq, %arg1, %c0_i32_40 : i32
    %82 = arith.extui %81 : i1 to i32
    %c0_i32_41 = arith.constant 0 : i32
    %83 = arith.cmpi ne, %82, %c0_i32_41 : i32
    scf.if %83 {
      %c0_42 = arith.constant 0 : index
      %c0_43 = arith.constant 0 : index
      %84 = vector.load %arg6[%c0_42, %c0_43] : memref<5x10xf32, #tpu.memory_space<vmem>>, vector<5x10xf32>
      %85 = vector.shape_cast %84 : vector<5x10xf32> to vector<1x5x10xf32>
      %c0_44 = arith.constant 0 : index
      %c0_45 = arith.constant 0 : index
      %c0_46 = arith.constant 0 : index
      %86 = vector.load %arg4[%c0_44, %c0_45, %c0_46] : memref<1x6x10xf32, #tpu.memory_space<vmem>>, vector<1x5x10xf32>
      tpu.vector_store %arg4[%c0_44, %c0_45, %c0_46], %85 {strides = array<i32>} : memref<1x6x10xf32, #tpu.memory_space<vmem>>, vector<1x5x10xf32>,
      %c0_47 = arith.constant 0 : index
      %87 = memref.load %arg5[%c0_47] : memref<1xf32, #tpu.memory_space<smem>>
      %88 = vector.broadcast %87 : f32 to vector<1x1x10xf32>
      %c0_48 = arith.constant 0 : index
      %c5 = arith.constant 5 : index
      %c0_49 = arith.constant 0 : index
      %89 = vector.load %arg4[%c0_48, %c5, %c0_49] : memref<1x6x10xf32, #tpu.memory_space<vmem>>, vector<1x1x10xf32>
      tpu.vector_store %arg4[%c0_48, %c5, %c0_49], %88 {strides = array<i32>} : memref<1x6x10xf32, #tpu.memory_space<vmem>>, vector<1x1x10xf32>,
    } else {
    }
    return
  }
  func.func @transform_0(%arg0: i32, %arg1: i32) -> (i32, i32) {
    %c1_i32 = arith.constant 1 : i32
    %0 = arith.muli %arg0, %c1_i32 : i32
    %1 = arith.addi %0, %arg1 : i32
    %c0_i32 = arith.constant 0 : i32
    %c0_i32_0 = arith.constant 0 : i32
    return %1, %c0_i32 : i32, i32
  }
  func.func @transform_1(%arg0: i32, %arg1: i32) -> (i32, i32) {
    %c1_i32 = arith.constant 1 : i32
    %0 = arith.muli %arg0, %c1_i32 : i32
    %1 = arith.addi %0, %arg1 : i32
    %c0_i32 = arith.constant 0 : i32
    %c0_i32_0 = arith.constant 0 : i32
    return %1, %c0_i32 : i32, i32
  }
  func.func @transform_2(%arg0: i32, %arg1: i32) -> (i32, i32, i32) {
    %c0_i32 = arith.constant 0 : i32
    %c0_i32_0 = arith.constant 0 : i32
    %c0_i32_1 = arith.constant 0 : i32
    return %arg0, %c0_i32, %c0_i32_0 : i32, i32, i32
  }
}

</mosaic_0001>

<bundles_post_ra>
// kernel: tpu_custom_call.1
= control target key start
LH: loop header
LB: loop body
LE: loop exit
PB: predicated region body
PF: predicated region fallthrough
CT: control target
= control target key end

     0   :  { %7 = vsyncpa [#allocation5], 0  ;;  %s417_s0 = inlined_call_operand.hbm [shape: f32[8,10], index: 0, kind: input, shape index: {}]   ;;  %s418_s1 = inlined_call_operand.hbm [shape: f32[8,10], index: 1, kind: input, shape index: {}]   ;;  %s419_s2 = inlined_call_operand.vmem [shape: f32[1,6,10], index: 2, kind: output, shape index: {}]  }
   0x1   :  { %s17_s11 = sshll.u32 %s417_s0, 4  ;;  %s18_s11 = int_to_ptr.hbm [resolvable:$true] %s17_s11 }
   0x2   :  { %8 = vsyncpa [#allocation7], 0  ;;  %s366_s12 = smov [#allocation4]   ;;  %s31_s16 = sshll.u32 %s418_s1, 4  ;;  %s32_s16 = int_to_ptr.hbm [resolvable:$true] %s31_s16 }
   0x3   :  { %s19_s13 = sshll.u32 %s366_s12, 4  ;;  %s367_s17 = smov [#allocation6]   ;;  %s20_s13 = int_to_ptr.vmem [resolvable:$true] %s19_s13 }
   0x4   :  { %22 = dma.hbm_to_vmem [thread:$0]  %s18_s11, 128, %s20_s13, [#allocation5]  }
   0x5   :  { %s33_s18 = sshll.u32 %s367_s17, 4  ;;  %s34_s18 = int_to_ptr.vmem [resolvable:$true] %s33_s18 }
   0x6   :  { %36 = dma.hbm_to_vmem [thread:$0]  %s32_s16, 128, %s34_s18, [#allocation7]  }
   0x7   :  { %362 = dma.done.wait [#allocation5], 128  }
   0x8   :  { %363 = vsyncadd [#allocation5], 4294967168 }
   0x9   :  { %364 = dma.done.wait [#allocation7], 128  }
   0xa   :  { %365 = vsyncadd [#allocation7], 4294967168  ;;  %v55_v0 = vld [vmem:[#allocation4] sm:$0xff]  ;;  %vm59_vm0 = vcmask 80896   ;;  %v57_v2 = vld [vmem:[#allocation6] sm:$0xff]  ;;  %vm153_vm1 = vcmask 64512  }
   0xb   :  { %v56_v1 = vmul.f32 0.25, %v55_v0  ;;  %v58_v4 = vmul.f32 0.25, %v57_v2  ;;  %v368_v44 = vmov 1.0   ;;  %vm138_vm10 = vcmask 7168  }
   0xc   :  { %vm53_vm11 = vcmask 77824   ;;  %vm178_vm12 = vcmask 73728  }
   0xd   :  { %v60_v3 = vsel %vm59_vm0, %v56_v1, -inf  ;;  %v71_v5 = vsel %vm59_vm0, %v58_v4, -inf }
   0xe   :  { %61 = vmax.xlane.f32.xlu0 %v60_v3 }
  0x16   :  { %72 = vmax.xlane.f32.xlu0 %v71_v5  ;;  %v369_v5 = vmov 0.0  }
  0x17   :  { %54 = vst.msk [vmem:[#allocation3] sm:$0x1f] %vm53_vm11, %v369_v5 }
  0x81   :  { %v62_v6 = vpop.xlane.xlu0 %61 }
  0x82   :  { %v63_v7 = vsub.f32 %v56_v1, %v62_v6 }
  0x84   :  { %v64_v8 = vmul.f32 1.442695, %v63_v7 }
  0x86   :  { %300 = vpow2.f32 %v64_v8 }
  0x89   :  { %v73_v9 = vpop.xlane.xlu0 %72 }
  0x8a   :  { %v74_v10 = vsub.f32 %v58_v4, %v73_v9  ;;  %v152_v9 = vld [vmem:[#allocation3] sm:$0x1] }
  0x8c   :  { %v301_v11 = vpop.eup %300  ;;  %v75_v12 = vmul.f32 1.442695, %v74_v10  ;;  %v180_v10 = vld [vmem:[#allocation3 + $0x1] sm:$0x1] }
  0x8d   :  { %v66_v13 = vsel %vm59_vm0, %v301_v11, 0.0 }
  0x8e   :  { %302 = vpow2.f32 %v75_v12  ;;  %67 = vadd.xlane.f32.xlu1 %v66_v13 }
  0x94   :  { %v303_v14 = vpop.eup %302 }
  0x95   :  { %v77_v15 = vsel %vm59_vm0, %v303_v14, 0.0 }
  0x96   :  { %78 = vadd.xlane.f32.xlu1 %v77_v15 }
 0x101   :  { %v68_v16 = vpop.xlane.xlu1 %67 }
 0x102   :  { %304 = vrcp.f32 %v68_v16  ;;  %v226_v16 = vld [vmem:[#allocation3 + $0x3] sm:$0x1] }
 0x108   :  { %v305_v17 = vpop.eup %304 }
 0x109   :  { %v79_v18 = vpop.xlane.xlu1 %78  ;;  %v70_v19 = vmul.f32 %v305_v17, %v301_v11  ;;  %v203_v11 = vld [vmem:[#allocation3 + $0x2] sm:$0x1]  ;;  %v249_v17 = vld [vmem:[#allocation3 + $0x4] sm:$0x1] }
 0x10a   :  { %306 = vrcp.f32 %v79_v18 }
 0x10b   :  { %v287_v20 = vadd.f32 -0.1, %v70_v19 }
 0x10d   :  { %172 = vmatpush.msra.mxu0 %v287_v20  ;;  %v84_v21 = vmul.f32 %v287_v20, %v287_v20 }
 0x10e   :  { %289 = vmatmul.msk.f32.vlgmr.msra.gmra.mxu0 %vm153_vm1, %v368_v44 }
 0x10f   :  { %219 = vmatpush.msra.mxu2 %v84_v21  ;;  %v87_v22 = vsel %vm59_vm0, %v84_v21, 0.0 }
 0x110   :  { %v307_v23 = vpop.eup %306  ;;  %88 = vadd.xlane.f32.xlu2 %v87_v22  ;;  %291 = vmatmul.msk.f32.vlgmr.msra.gmra.mxu2 %vm153_vm1, %v368_v44 }
 0x111   :  { %v81_v24 = vmul.f32 %v307_v23, %v303_v14 }
 0x113   :  { %v288_v25 = vadd.f32 -0.1, %v81_v24 }
 0x115   :  { %196 = vmatpush.msra.mxu1 %v288_v25  ;;  %v85_v26 = vmul.f32 %v288_v25, %v288_v25  ;;  %v86_v27 = vmul.f32 %v288_v25, %v287_v20 }
 0x116   :  { %290 = vmatmul.msk.f32.vlgmr.msra.gmra.mxu1 %vm153_vm1, %v368_v44 }
 0x117   :  { %242 = vmatpush.msra.mxu3 %v85_v26  ;;  %265 = vmatpush.msrb.mxu0 %v86_v27  ;;  %v93_v28 = vsel %vm59_vm0, %v86_v27, 0.0  ;;  %v90_v29 = vsel %vm59_vm0, %v85_v26, 0.0 }
 0x118   :  { %94 = vadd.xlane.f32.xlu0 %v93_v28  ;;  %91 = vadd.xlane.f32.xlu2 %v90_v29 }
 0x119   :  { %292 = vmatmul.msk.f32.vlgmr.msra.gmra.mxu3 %vm153_vm1, %v368_v44  ;;  %293 = vmatmul.msk.f32.vlgmr.msrb.gmra.mxu0 %vm153_vm1, %v368_v44 }
 0x183   :  { %v89_v30 = vpop.xlane.xlu2 %88 }
 0x184   :  { %308 = vrsqrt.f32 %v89_v30  ;;  %vm103_vm2 = vcmp.eq.f32.partialorder %v89_v30, inf  ;;  %v106_v48 = vand.u32 2147483648, %v89_v30  ;;  %vm105_vm4 = vcmp.eq.f32.partialorder %v89_v30, 0.0 }
 0x18a   :  { %v309_v31 = vpop.eup %308 }
 0x18b   :  { %v97_v32 = vmul.f32 %v309_v31, %v89_v30  ;;  %v92_v33 = vpop.xlane.xlu2 %91  ;;  %v95_v0 = vpop.xlane.xlu0 %94 }
 0x18c   :  { %310 = vrsqrt.f32 %v92_v33  ;;  %vm115_vm3 = vcmp.eq.f32.partialorder %v92_v33, inf  ;;  %v118_v49 = vand.u32 2147483648, %v92_v33  ;;  %vm117_vm5 = vcmp.eq.f32.partialorder %v92_v33, 0.0  ;;  %v174_v4 = vpop.f32.mrf.mxu0 }
 0x18d   :  { %v98_v34 = vmul.f32 %v309_v31, %v97_v32  ;;  %v177_v13 = vadd.f32 %v174_v4, %v152_v9 }
 0x18f   :  { %v99_v35 = vmul.f32 0.5, %v98_v34  ;;  %179 = vst.msk [vmem:[#allocation3] sm:$0x1] %vm178_vm12, %v177_v13 }
 0x191   :  { %v100_v36 = vsub.f32 1.5, %v99_v35 }
 0x192   :  { %v311_v37 = vpop.eup %310 }
 0x193   :  { %v109_v38 = vmul.f32 %v311_v37, %v92_v33  ;;  %v101_v39 = vmul.f32 %v309_v31, %v100_v36  ;;  %v198_v6 = vpop.f32.mrf.mxu1  ;;  %v221_v7 = vpop.f32.mrf.mxu2 }
 0x194   :  { %v201_v14 = vadd.f32 %v198_v6, %v180_v10  ;;  %v224_v15 = vadd.f32 %v221_v7, %v203_v11 }
 0x195   :  { %v110_v40 = vmul.f32 %v311_v37, %v109_v38  ;;  %v102_v42 = vmul.f32 %v101_v39, %v89_v30 }
 0x196   :  { %v267_v12 = vpop.f32.mrf.mxu0  ;;  %202 = vst.msk [vmem:[#allocation3 + $0x1] sm:$0x1] %vm178_vm12, %v201_v14 }
 0x197   :  { %v111_v41 = vmul.f32 0.5, %v110_v40  ;;  %v104_v46 = vsel %vm103_vm2, %v89_v30, %v102_v42  ;;  %v270_v19 = vadd.f32 %v267_v12, %v249_v17  ;;  %225 = vst.msk [vmem:[#allocation3 + $0x2] sm:$0x1] %vm178_vm12, %v224_v15 }
 0x198   :  { %v107_v51 = vsel %vm105_vm4, %v106_v48, %v104_v46 }
 0x199   :  { %v112_v43 = vsub.f32 1.5, %v111_v41  ;;  %271 = vst.msk [vmem:[#allocation3 + $0x4] sm:$0x1] %vm178_vm12, %v270_v19 }
 0x19b   :  { %v113_v45 = vmul.f32 %v311_v37, %v112_v43 }
 0x19c   :  { %v244_v8 = vpop.f32.mrf.mxu3 }
 0x19d   :  { %v114_v47 = vmul.f32 %v113_v45, %v92_v33  ;;  %v247_v18 = vadd.f32 %v244_v8, %v226_v16 }
 0x19f   :  { %v116_v50 = vsel %vm115_vm3, %v92_v33, %v114_v47  ;;  %248 = vst.msk [vmem:[#allocation3 + $0x3] sm:$0x1] %vm178_vm12, %v247_v18 }
 0x1a0   :  { %v119_v52 = vsel %vm117_vm5, %v118_v49, %v116_v50 }
 0x1a1   :  { %v120_v53 = vmul.f32 %v119_v52, %v107_v51 }
 0x1a3   :  { %v121_v54 = vadd.f32 1e-05, %v120_v53 }
 0x1a5   :  { %312 = vrcp.f32 %v121_v54  ;;  %v133_v58 = vand.u32 2147483648, %v121_v54  ;;  %v131_v60 = vand.u32 2147483647, %v121_v54  ;;  %vm127_vm7 = vweird.f32 %v121_v54 }
 0x1a6   :  { %v275_v23 = vld [vmem:[#allocation3] sm:$0x1f] }
 0x1a7   :  { %v134_v62 = vor.u32 1.1754944e-38, %v133_v58  ;;  %vm132_vm9 = vcmp.eq.f32.partialorder %v131_v60, 8.507059e+37  ;;  %277 = vst.msk [vmem:[%s419_s2] sm:$0x1f] %vm53_vm11, %v275_v23 }
 0x1ab   :  { %v313_v55 = vpop.eup %312 }
 0x1ac   :  { %v123_v56 = vmul.f32 %v313_v55, %v121_v54  ;;  %vm128_vm6 = vweird.f32 %v313_v55 }
 0x1ad   :  { %vm129_vm8 = vmor %vm127_vm7, %vm128_vm6 }
 0x1ae   :  { %v124_v57 = vsub.f32 1.0, %v123_v56 }
 0x1b0   :  { %v125_v59 = vmul.f32 %v313_v55, %v124_v57 }
 0x1b2   :  { %v126_v61 = vadd.f32 %v313_v55, %v125_v59 }
 0x1b4   :  { %v130_v63 = vsel %vm129_vm8, %v313_v55, %v126_v61 }
 0x1b5   :  { %v135_v1 = vsel %vm132_vm9, %v134_v62, %v130_v63 }
 0x1b6   :  { %v136_v2 = vmul.f32 %v135_v1, %v95_v0 }
 0x1b8   :  { %v139_v3 = vsel %vm138_vm10, %v136_v2, 0.0 }
 0x1b9   :  { %140 = vadd.xlane.f32.xlu1 %v139_v3 }
 0x22c   :  { %v141_v20 = vpop.xlane.xlu1 %140 }
 0x22d   :  { %v142_v21 = vrot.slane %v141_v20, 4 }
 0x22f   :  { %v143_v22 = vadd.f32 %v142_v21, %v141_v20 }
 0x231   :  { %v144_v24 = vrot.slane %v143_v22, 2 }
 0x233   :  { %v145_v25 = vadd.f32 %v144_v24, %v143_v22 }
 0x235   :  { %v146_v26 = vrot.slane %v145_v25, 1 }
 0x237   :  { %v147_v27 = vadd.f32 %v146_v26, %v145_v25 }
 0x239   :  { %294 = vpush %v147_v27 }
 0x26a   :  { %s295_s19 = spop %294 }
 0x26b   :  { %v279_v28 = vstv %s295_s19 }
 0x26c   :  { %280 = vst.msk [vmem:[%s419_s2 + $0x5] sm:$0x1] %vm178_vm12, %v279_v28 }
 0x26d   :  { %285 = vsyncpa [#allocation5], 1 }
 0x26e   :  { %286 = vsyncpa [#allocation7], 1 }

</bundles_post_ra>
